<compile_context>
chip_gen: v6e
topology: v6e:2x2x1
jax: 0.10.0
libtpu: 0.0.40
codegen_flags: <defaults>
</compile_context>

<pallas_src>
import functools

import jax
import jax.numpy as jnp
from jax.experimental import pallas as pl
from jax.experimental.pallas import tpu as pltpu


def _round_up(x, m):
    return ((x + m - 1) // m) * m


def _mlp_kernel(x_ref, w1_ref, b1_ref, w2_ref, b2_ref, w3_ref, b3_ref, o_ref):
    # Per-tile bf16 cast on the VPU (hidden under the x-tile DMA).
    x = x_ref[...].astype(jnp.bfloat16)                        # (TB, F)

    # Layer 1: MXU matmul (bf16 in, f32 acc); bias-add + ReLU in f32 on the VPU.
    h1 = jnp.dot(x, w1_ref[...], preferred_element_type=jnp.float32)
    h1 = jnp.maximum(h1 + b1_ref[...], 0.0)                    # (TB, H) f32
    # TODO(synk): training-mode Dropout(0.1) via pltpu.prng_seed/prng_random_bits;
    # eval-mode dropout is the identity, so it is compiled out here.

    # Layer 2.
    h2 = jnp.dot(h1.astype(jnp.bfloat16), w2_ref[...],
                 preferred_element_type=jnp.float32)
    h2 = jnp.maximum(h2 + b2_ref[...], 0.0)                    # (TB, H) f32

    # Layer 3 (H -> 1): VPU multiply + XLU cross-lane reduce (avoids an N=1 MXU
    # pass); b3 scalar comes from SMEM.  The (TB,1)->(1,TB) relayout puts the
    # batch on lanes so the output store is lane-dense (unmasked) instead of a
    # masked lane-width-1 store per row.
    col = jnp.sum(h2 * w3_ref[...], axis=-1, keepdims=True) + b3_ref[0, 0]  # (TB,1)
    o_ref[...] = col.T.astype(o_ref.dtype)                     # (1, TB)


def prepare_params(params):
    """One-time parameter prep (outside the per-call path):
    transpose to (in, out), cast matmul weights to bf16, reshape biases."""
    H = params["w1"].shape[0]
    return {
        "w1": jnp.asarray(params["w1"]).T.astype(jnp.bfloat16),             # (F, H)
        "b1": jnp.asarray(params["b1"]).reshape(1, H).astype(jnp.float32),
        "w2": jnp.asarray(params["w2"]).T.astype(jnp.bfloat16),             # (H, H)
        "b2": jnp.asarray(params["b2"]).reshape(1, H).astype(jnp.float32),
        "w3": jnp.asarray(params["w3"]).reshape(1, H).astype(jnp.float32),  # row
        "b3": jnp.asarray(params["b3"]).reshape(1, 1).astype(jnp.float32),
    }


@functools.partial(jax.jit, static_argnames=("tb",))
def dnn_forward(x, prep, *, tb=512):
    """Forward pass of DNN as one fused Pallas TPU kernel.

    x: (B, in_features) float32 -- passed to the kernel untouched (no cast/pad).
    prep: output of prepare_params()
    returns: (B,) float32 (like the PyTorch module's .squeeze())
    """
    B, F = x.shape
    H = prep["w1"].shape[1]

    # --- batch tiling --------------------------------------------------------
    # Big tiles (per-grid-step overhead ~0.35us; 128-row tiles reach only ~29% of
    # HBM roofline vs ~85% at 512), 128-aligned output lanes whenever there is
    # more than one tile, and >=2 grid steps when B allows it so both v7x
    # TensorCores get work (v5e/v6e have a single TC; no effect there).
    tb = max(128, _round_up(tb, 128))
    if B > tb:
        TB = tb                                    # many 128-aligned tiles
    elif B >= 256:
        TB = _round_up(pl.cdiv(B, 2), 128)         # exactly two tiles
    else:
        TB = B                                     # one full-batch tile
    num_tiles = pl.cdiv(B, TB)
    padded = num_tiles * TB                        # >= B; extra cols sliced off

    # VMEM budget for the resident-weights design (double-buffered x/out tiles):
    #   2*TB*F*4 (x f32) + 2*TB*4 (out) + 2*(F*H + H*H)*2 (bf16 weights, dbl-buf)
    #   + ~3*H*4 + 4  ->  ~70 KiB at TB=512, F=16, H=32 (far under 32 MiB).
    # TODO(synk): if H grows past a few thousand (v7x has only 64 MiB VMEM),
    # switch to a K/N-tiled grid over H with an f32 VMEM accumulator
    # ("arbitrary" reduction axis) instead of keeping w2 fully resident.
    flops = 2 * padded * (F * H + H * H + H)
    bytes_accessed = (
        padded * F * 4                    # x (f32, read in place, no extra pass)
        + (F * H + H * H) * 2             # w1, w2 (bf16, fetched once)
        + (2 * H + H + 1) * 4             # b1, b2, w3 row, b3 (f32)
        + padded * 4                      # lane-dense output row (f32)
    )

    out_row = pl.pallas_call(
        _mlp_kernel,
        out_shape=jax.ShapeDtypeStruct((1, padded), jnp.float32),
        grid=(num_tiles,),
        in_specs=[
            pl.BlockSpec((TB, F), lambda i: (i, 0)),             # x tile (pipelined)
            pl.BlockSpec((F, H), lambda i: (0, 0)),              # w1 (resident)
            pl.BlockSpec((1, H), lambda i: (0, 0)),              # b1 (resident)
            pl.BlockSpec((H, H), lambda i: (0, 0)),              # w2 (resident)
            pl.BlockSpec((1, H), lambda i: (0, 0)),              # b2 (resident)
            pl.BlockSpec((1, H), lambda i: (0, 0)),              # w3 row (resident)
            pl.BlockSpec(memory_space=pltpu.MemorySpace.SMEM),   # b3 scalar in SMEM
        ],
        out_specs=pl.BlockSpec((1, TB), lambda i: (0, i)),       # lane-dense output
        compiler_params=pltpu.CompilerParams(
            dimension_semantics=("parallel",),
            vmem_limit_bytes=32 * 1024 * 1024,
        ),
        cost_estimate=pl.CostEstimate(
            flops=flops, transcendentals=0, bytes_accessed=bytes_accessed),
    )(x, prep["w1"], prep["b1"], prep["w2"], prep["b2"], prep["w3"], prep["b3"])

    return out_row[0, :B]


def init_params(key, in_features, hidden_size):
    """Deterministic init matching the PyTorch module's layer shapes."""
    k1, k2, k3, k4, k5, k6 = jax.random.split(key, 6)
    scale1 = 1.0 / jnp.sqrt(in_features)
    scale2 = 1.0 / jnp.sqrt(hidden_size)
    return {
        "w1": jax.random.uniform(k1, (hidden_size, in_features), jnp.float32,
                                 -scale1, scale1),
        "b1": jax.random.uniform(k2, (hidden_size,), jnp.float32, -scale1, scale1),
        "w2": jax.random.uniform(k3, (hidden_size, hidden_size), jnp.float32,
                                 -scale2, scale2),
        "b2": jax.random.uniform(k4, (hidden_size,), jnp.float32, -scale2, scale2),
        "w3": jax.random.uniform(k5, (1, hidden_size), jnp.float32, -scale2, scale2),
        "b3": jax.random.uniform(k6, (1,), jnp.float32, -scale2, scale2),
    }


if __name__ == "__main__":
    key = jax.random.PRNGKey(0)
    k_x, k_p = jax.random.split(key)

    in_features = 16
    hidden_size = 32
    params = init_params(k_p, in_features, hidden_size)
    prep = prepare_params(params)

    def reference_bf16(x):
        # Same math as the kernel (bf16 matmul inputs, f32 accumulation / epilogue).
        xb = x.astype(jnp.bfloat16)
        w1b = params["w1"].T.astype(jnp.bfloat16)
        w2b = params["w2"].T.astype(jnp.bfloat16)
        h1 = jnp.maximum(jnp.dot(xb, w1b, preferred_element_type=jnp.float32)
                         + params["b1"], 0.0)
        h2 = jnp.maximum(jnp.dot(h1.astype(jnp.bfloat16), w2b,
                                 preferred_element_type=jnp.float32)
                         + params["b2"], 0.0)
        return jnp.sum(h2 * params["w3"].reshape(1, -1), axis=-1) + params["b3"][0]

    def reference_f32(x):
        # Full-f32 PyTorch-equivalent forward (loose tolerance vs the bf16 kernel).
        h1 = jnp.maximum(x @ params["w1"].T + params["b1"], 0.0)
        h2 = jnp.maximum(h1 @ params["w2"].T + params["b2"], 0.0)
        return (h2 @ params["w3"].T + params["b3"]).squeeze(-1)

    # batch=50  -> single full-batch tile (grid of 1).
    # batch=300 -> two 256-row tiles, ragged last input block, sliced output.
    for batch in (50, 300):
        x = jax.random.normal(jax.random.fold_in(k_x, batch),
                              (batch, in_features), jnp.float32)
        y = dnn_forward(x, prep)
        jax.block_until_ready(y)
        assert y.shape == (batch,)
        assert jnp.allclose(y, reference_bf16(x), atol=2e-3, rtol=2e-3)
        assert jnp.allclose(y, reference_f32(x), atol=5e-2, rtol=5e-2)

    print("KERNEL_OK")
</pallas_src>

<mosaic_0001>
module attributes {stable_mosaic.version = 11 : i64} {
  func.func @_mlp_kernel(%arg0: i32, %arg1: memref<50x16xf32, #tpu.memory_space<vmem>>, %arg2: memref<16x32xbf16, #tpu.memory_space<vmem>>, %arg3: memref<1x32xf32, #tpu.memory_space<vmem>>, %arg4: memref<32x32xbf16, #tpu.memory_space<vmem>>, %arg5: memref<1x32xf32, #tpu.memory_space<vmem>>, %arg6: memref<1x32xf32, #tpu.memory_space<vmem>>, %arg7: memref<1x1xf32, #tpu.memory_space<smem>>, %arg8: memref<1x50xf32, #tpu.memory_space<vmem>>) attributes {dimension_semantics = [#tpu.dimension_semantics<parallel>], iteration_bounds = array<i64: 1>, scalar_prefetch = 0 : i64, scratch_operands = 0 : i64, tpu.core_type = #tpu.core_type<tc>, window_params = [{transform_indices = @transform_0, window_bounds = array<i64: 50, 16>}, {pipeline_mode = #tpu.pipeline_mode<synchronous>, transform_indices = @transform_1, window_bounds = array<i64: 16, 32>}, {pipeline_mode = #tpu.pipeline_mode<synchronous>, transform_indices = @transform_2, window_bounds = array<i64: 1, 32>}, {pipeline_mode = #tpu.pipeline_mode<synchronous>, transform_indices = @transform_3, window_bounds = array<i64: 32, 32>}, {pipeline_mode = #tpu.pipeline_mode<synchronous>, transform_indices = @transform_4, window_bounds = array<i64: 1, 32>}, {pipeline_mode = #tpu.pipeline_mode<synchronous>, transform_indices = @transform_5, window_bounds = array<i64: 1, 32>}, {transform_indices = @transform_6, window_bounds = array<i64: 1, 1>}, {transform_indices = @transform_7, window_bounds = array<i64: 1, 50>}]} {
    %c0 = arith.constant 0 : index
    %c0_0 = arith.constant 0 : index
    %0 = vector.load %arg1[%c0, %c0_0] : memref<50x16xf32, #tpu.memory_space<vmem>>, vector<50x16xf32>
    %1 = arith.truncf %0 : vector<50x16xf32> to vector<50x16xbf16>
    %c0_1 = arith.constant 0 : index
    %c0_2 = arith.constant 0 : index
    %2 = vector.load %arg2[%c0_1, %c0_2] : memref<16x32xbf16, #tpu.memory_space<vmem>>, vector<16x32xbf16>
    %cst = arith.constant dense<0.000000e+00> : vector<50x32xf32>
    %3 = tpu.matmul %1, %2, %cst {dimension_numbers = #tpu.dot_dimension_numbers<[1], [0], [0], [1], [0, 0, 1, 1], [], []>} : vector<50x16xbf16>, vector<16x32xbf16>, vector<50x32xf32> -> vector<50x32xf32>
    %c0_3 = arith.constant 0 : index
    %c0_4 = arith.constant 0 : index
    %4 = vector.load %arg3[%c0_3, %c0_4] : memref<1x32xf32, #tpu.memory_space<vmem>>, vector<1x32xf32>
    %5 = vector.broadcast %4 : vector<1x32xf32> to vector<50x32xf32>
    %6 = arith.addf %3, %5 : vector<50x32xf32>
    %cst_5 = arith.constant 0.000000e+00 : f32
    %7 = vector.broadcast %cst_5 : f32 to vector<50x32xf32>
    %8 = arith.maximumf %6, %7 : vector<50x32xf32>
    %9 = arith.truncf %8 : vector<50x32xf32> to vector<50x32xbf16>
    %c0_6 = arith.constant 0 : index
    %c0_7 = arith.constant 0 : index
    %10 = vector.load %arg4[%c0_6, %c0_7] : memref<32x32xbf16, #tpu.memory_space<vmem>>, vector<32x32xbf16>
    %cst_8 = arith.constant dense<0.000000e+00> : vector<50x32xf32>
    %11 = tpu.matmul %9, %10, %cst_8 {dimension_numbers = #tpu.dot_dimension_numbers<[1], [0], [0], [1], [0, 0, 1, 1], [], []>} : vector<50x32xbf16>, vector<32x32xbf16>, vector<50x32xf32> -> vector<50x32xf32>
    %c0_9 = arith.constant 0 : index
    %c0_10 = arith.constant 0 : index
    %12 = vector.load %arg5[%c0_9, %c0_10] : memref<1x32xf32, #tpu.memory_space<vmem>>, vector<1x32xf32>
    %13 = vector.broadcast %12 : vector<1x32xf32> to vector<50x32xf32>
    %14 = arith.addf %11, %13 : vector<50x32xf32>
    %cst_11 = arith.constant 0.000000e+00 : f32
    %15 = vector.broadcast %cst_11 : f32 to vector<50x32xf32>
    %16 = arith.maximumf %14, %15 : vector<50x32xf32>
    %c0_12 = arith.constant 0 : index
    %c0_13 = arith.constant 0 : index
    %17 = vector.load %arg6[%c0_12, %c0_13] : memref<1x32xf32, #tpu.memory_space<vmem>>, vector<1x32xf32>
    %18 = vector.broadcast %17 : vector<1x32xf32> to vector<50x32xf32>
    %19 = arith.mulf %16, %18 : vector<50x32xf32>
    %cst_14 = arith.constant dense<0.000000e+00> : vector<50xf32>
    %20 = vector.multi_reduction <add>, %19, %cst_14 [1] : vector<50x32xf32> to vector<50xf32>
    %21 = vector.shape_cast %20 : vector<50xf32> to vector<50x1xf32>
    %c0_15 = arith.constant 0 : index
    %c0_16 = arith.constant 0 : index
    %22 = memref.load %arg7[%c0_15, %c0_16] : memref<1x1xf32, #tpu.memory_space<smem>>
    %23 = vector.broadcast %22 : f32 to vector<50x1xf32>
    %24 = arith.addf %21, %23 : vector<50x1xf32>
    %25 = tpu.transpose %24, [1, 0] : vector<50x1xf32> -> vector<1x50xf32>
    %c0_17 = arith.constant 0 : index
    %c0_18 = arith.constant 0 : index
    %26 = vector.load %arg8[%c0_17, %c0_18] : memref<1x50xf32, #tpu.memory_space<vmem>>, vector<1x50xf32>
    tpu.vector_store %arg8[%c0_17, %c0_18], %25 {strides = array<i32>} : memref<1x50xf32, #tpu.memory_space<vmem>>, vector<1x50xf32>,
    return
  }
  func.func @transform_0(%arg0: i32) -> (i32, i32) {
    %c0_i32 = arith.constant 0 : i32
    %c0_i32_0 = arith.constant 0 : i32
    return %arg0, %c0_i32 : i32, i32
  }
  func.func @transform_1(%arg0: i32) -> (i32, i32) {
    %c0_i32 = arith.constant 0 : i32
    %c0_i32_0 = arith.constant 0 : i32
    %c0_i32_1 = arith.constant 0 : i32
    return %c0_i32, %c0_i32_0 : i32, i32
  }
  func.func @transform_2(%arg0: i32) -> (i32, i32) {
    %c0_i32 = arith.constant 0 : i32
    %c0_i32_0 = arith.constant 0 : i32
    %c0_i32_1 = arith.constant 0 : i32
    return %c0_i32, %c0_i32_0 : i32, i32
  }
  func.func @transform_3(%arg0: i32) -> (i32, i32) {
    %c0_i32 = arith.constant 0 : i32
    %c0_i32_0 = arith.constant 0 : i32
    %c0_i32_1 = arith.constant 0 : i32
    return %c0_i32, %c0_i32_0 : i32, i32
  }
  func.func @transform_4(%arg0: i32) -> (i32, i32) {
    %c0_i32 = arith.constant 0 : i32
    %c0_i32_0 = arith.constant 0 : i32
    %c0_i32_1 = arith.constant 0 : i32
    return %c0_i32, %c0_i32_0 : i32, i32
  }
  func.func @transform_5(%arg0: i32) -> (i32, i32) {
    %c0_i32 = arith.constant 0 : i32
    %c0_i32_0 = arith.constant 0 : i32
    %c0_i32_1 = arith.constant 0 : i32
    return %c0_i32, %c0_i32_0 : i32, i32
  }
  func.func @transform_6(%arg0: i32) -> (i32, i32) {
    %c0_i32 = arith.constant 0 : i32
    %c0_i32_0 = arith.constant 0 : i32
    %c0_i32_1 = arith.constant 0 : i32
    return %c0_i32, %c0_i32_0 : i32, i32
  }
  func.func @transform_7(%arg0: i32) -> (i32, i32) {
    %c0_i32 = arith.constant 0 : i32
    %c0_i32_0 = arith.constant 0 : i32
    return %c0_i32, %arg0 : i32, i32
  }
}

</mosaic_0001>

<bundles_post_ra>
// kernel: dnn_forward.1
= control target key start
LH: loop header
LB: loop body
LE: loop exit
PB: predicated region body
PF: predicated region fallthrough
CT: control target
= control target key end

     0   :  { %vm55_vm0 = vcmask 130048   ;;  %s517_s0 = inlined_call_operand.vmem [shape: f32[50,16], index: 0, kind: input, shape index: {}]   ;;  %s518_s1 = inlined_call_operand.vmem [shape: bf16[16,32], index: 1, kind: input, shape index: {}]   ;;  %s519_s2 = inlined_call_operand.vmem [shape: f32[1,32], index: 2, kind: input, shape index: {}]   ;;  %s520_s3 = inlined_call_operand.vmem [shape: bf16[32,32], index: 3, kind: input, shape index: {}]   ;;  %s521_s4 = inlined_call_operand.vmem [shape: f32[1,32], index: 4, kind: input, shape index: {}]   ;;  %s522_s5 = inlined_call_operand.vmem [shape: f32[1,32], index: 5, kind: input, shape index: {}]   ;;  %s523_s6 = inlined_call_operand.<no memory space> [shape: f32[1,1], index: 6, kind: input, shape index: {}]   ;;  %s524_s7 = inlined_call_operand.hbm [shape: f32[1,50], index: 7, kind: output, shape index: {}]  }
   0x1   :  { %v392_v0 = vld [vmem:[%s518_s1] sm:$0xff]   ;;  %v30_v2 = vld [vmem:[%s517_s0 + $0x8] sm:$0xff]  ;;  %v31_v3 = vld [vmem:[%s517_s0 + $0x10] sm:$0xff] }
   0x2   :  { %v29_v1 = vld [vmem:[%s517_s0] sm:$0xff]  ;;  %368 = vmatprep.subr.bf16.mxu0 %v392_v0  ;;  %v32_v5 = vld [vmem:[%s517_s0 + $0x18] sm:$0xff]  ;;  %v34_v7 = vld [vmem:[%s517_s0 + $0x28] sm:$0xff] }
   0x3   :  { %v36_v4 = vpack.c.bf16 %v30_v2, %v29_v1  ;;  %v33_v6 = vld [vmem:[%s517_s0 + $0x20] sm:$0xff]  ;;  %369 = vmatpush3.bf16.msra.mxu0 %v392_v0  ;;  %v37_v8 = vpack.c.bf16 %v32_v5, %v31_v3 }
   0x4   :  { %v38_v9 = vpack.c.bf16 %v34_v7, %v33_v6 }
   0x5   :  { %370 = vmatprep.mubr.msk.bf16.mxu0 %vm55_vm0, %v36_v4 }
   0x6   :  { %13 = vsyncpa [#allocation4], 0  ;;  %371 = vmatmul.mubr.msk.bf16.vlgmr.msra.gmra.mxu0 %vm55_vm0, %v37_v8  ;;  %v35_v10 = vld [vmem:[%s517_s0 + $0x30] sm:$0x3]  ;;  %v393_v12 = vld [vmem:[%s520_s3 + $0x8] sm:$0xff]   ;;  %vm166_vm1 = vcmask 261120  }
   0x7   :  { %374 = vmatprep.mubr.msk.bf16.mxu0 %vm55_vm0, %v38_v9  ;;  %v39_v11 = vpack.c.bf16 %v35_v10, %v35_v10  ;;  %378 = vmatprep.subr.bf16.mxu1 %v393_v12  ;;  %v394_v13 = vld [vmem:[%s520_s3] sm:$0xff]   ;;  %vm282_vm2 = vcmask 254976   ;;  %vm327_vm3 = vcmask 401408  }
   0x8   :  { %379 = vmatpush3.bf16.msra.mxu1 %v393_v12  ;;  %v343_v16 = vld [vmem:[%s519_s2] ss:$0 sm:$0xff] }
   0x9   :  { %380 = vmatprep.subr.bf16.mxu1 %v394_v13  ;;  %v349_v41 = vld [vmem:[%s521_s4] ss:$0 sm:$0xff] }
   0xa   :  { %v356_v45 = vld [vmem:[%s522_s5] ss:$0 sm:$0xff] }
   0xc   :  { %381 = vmatpush3.bf16.msra.mxu1 %v394_v13 }
   0xe   :  { %375 = vmatmul.mubr.msk.bf16.gmra.mxu0 %vm55_vm0, %v39_v11 }
  0xc6   :  { %v372_v14 = vpop.f32.mrf.mxu0 }
  0xc7   :  { %v111_v20 = vadd.f32 %v372_v14, %v343_v16 }
  0xc8   :  { %v102_v15 = vpop.f32.mrf.mxu0 }
  0xc9   :  { %v103_v18 = vadd.f32 %v343_v16, %v102_v15  ;;  %v134_v27 = vmax.f32 %v111_v20, 0.0  ;;  %v287_v15 = vstv %s523_s6  ;;  %s417_s6 = smov [#allocation3]  }
  0xca   :  { %v373_v17 = vpop.f32.mrf.mxu0  ;;  %s335_s23 = sshll.u32 %s417_s6, 4  ;;  %s336_s23 = int_to_ptr.vmem [resolvable:$true] %s335_s23 }
  0xcb   :  { %v114_v19 = vadd.f32 %v373_v17, %v343_v16  ;;  %v132_v25 = vmax.f32 %v103_v18, 0.0  ;;  %s395_s24 = scalar_lea.vmem %s336_s23, 16  ;;  %s399_s25 = scalar_lea.vmem %s336_s23, 32 }
  0xcc   :  { %v105_v21 = vpop.f32.mrf.mxu0  ;;  %p396_p0 = scmp.ne.s32.totalorder %s336_s23, %s395_s24  ;;  %p400_p1 = scmp.lt.s32.totalorder %s336_s23, %s336_s23 }
  0xcd   :  { %v106_v22 = vadd.f32 %v343_v16, %v105_v21  ;;  %v135_v23 = vmax.f32 %v114_v19, 0.0  ;;  %p401_p2 = scmp.lt.s32.totalorder %s399_s25, %s395_s24 }
  0xce   :  { %v376_v24 = vpop.f32.mrf.mxu0 }
  0xcf   :  { %v133_v26 = vmax.f32 %v106_v22, 0.0  ;;  %v127_v28 = vadd.f32 %v376_v24, %v343_v16  ;;  %v140_v32 = vpack.c.bf16 %v135_v23, %v134_v27  ;;  %p402_p3 = por %p401_p2, %p400_p1 }
  0xd0   :  { %v118_v29 = vpop.f32.mrf.mxu0 }
  0xd1   :  { %v119_v30 = vadd.f32 %v343_v16, %v118_v29  ;;  %v139_v31 = vpack.c.bf16 %v133_v26, %v132_v25  ;;  %v138_v34 = vmax.f32 %v127_v28, 0.0  ;;  %p403_p4 = pnand %p402_p3, %p396_p0 }
  0xd2   :  { %v377_v33 = vpop.f32.mrf.mxu0 }
  0xd3   :  { %382 = vmatprep.mubr.msk.bf16.mxu1 %vm166_vm1, %v139_v31  ;;  %v136_v36 = vmax.f32 %v119_v30, 0.0  ;;  %v142_v39 = vpack.c.bf16 %v138_v34, %v138_v34 }
  0xd4   :  { %v121_v35 = vpop.f32.mrf.mxu0  ;;  %383 = vmatmul.mubr.msk.bf16.vlgmr.msra.gmra.mxu1 %vm166_vm1, %v140_v32 }
  0xd5   :  { %v122_v37 = vadd.f32 %v343_v16, %v121_v35 }
  0xd7   :  { %v137_v38 = vmax.f32 %v122_v37, 0.0 }
  0xd9   :  { %v141_v40 = vpack.c.bf16 %v137_v38, %v136_v36 }
  0xdb   :  { %386 = vmatprep.mubr.msk.bf16.mxu1 %vm166_vm1, %v141_v40 }
  0xdc   :  { %387 = vmatmul.mubr.msk.bf16.gmra.mxu1 %vm166_vm1, %v142_v39 }
 0x194   :  { %v384_v42 = vpop.f32.mrf.mxu1 }
 0x195   :  { %v222_v43 = vadd.f32 %v384_v42, %v349_v41 }
 0x196   :  { %v213_v44 = vpop.f32.mrf.mxu1 }
 0x197   :  { %v245_v46 = vmax.f32 %v222_v43, 0.0  ;;  %v214_v47 = vadd.f32 %v349_v41, %v213_v44 }
 0x198   :  { %v385_v48 = vpop.f32.mrf.mxu1 }
 0x199   :  { %v243_v49 = vmax.f32 %v214_v47, 0.0  ;;  %v225_v50 = vadd.f32 %v385_v48, %v349_v41  ;;  %v259_v51 = vmul.f32 %v356_v45, %v245_v46 }
 0x19a   :  { %v216_v52 = vpop.f32.mrf.mxu1 }
 0x19b   :  { %v246_v53 = vmax.f32 %v225_v50, 0.0  ;;  %v217_v54 = vadd.f32 %v349_v41, %v216_v52  ;;  %v270_v55 = vsel %vm166_vm1, %v259_v51, 0.0  ;;  %v257_v56 = vmul.f32 %v356_v45, %v243_v49 }
 0x19c   :  { %271 = vadd.xlane.f32.xlu1 %v270_v55  ;;  %v388_v57 = vpop.f32.mrf.mxu1 }
 0x19d   :  { %v244_v58 = vmax.f32 %v217_v54, 0.0  ;;  %v238_v59 = vadd.f32 %v388_v57, %v349_v41  ;;  %v264_v60 = vsel %vm166_vm1, %v257_v56, 0.0  ;;  %v260_v61 = vmul.f32 %v356_v45, %v246_v53 }
 0x19e   :  { %v229_v62 = vpop.f32.mrf.mxu1  ;;  %265 = vadd.xlane.f32.xlu0 %v264_v60 }
 0x19f   :  { %v230_v63 = vadd.f32 %v349_v41, %v229_v62  ;;  %v273_v0 = vsel %vm166_vm1, %v260_v61, 0.0  ;;  %v258_v1 = vmul.f32 %v356_v45, %v244_v58  ;;  %v249_v3 = vmax.f32 %v238_v59, 0.0 }
 0x1a0   :  { %274 = vadd.xlane.f32.xlu1 %v273_v0  ;;  %v389_v2 = vpop.f32.mrf.mxu1 }
 0x1a1   :  { %v247_v4 = vmax.f32 %v230_v63, 0.0  ;;  %v267_v5 = vsel %vm166_vm1, %v258_v1, 0.0  ;;  %v263_v11 = vmul.f32 %v356_v45, %v249_v3 }
 0x1a2   :  { %v232_v6 = vpop.f32.mrf.mxu1  ;;  %268 = vadd.xlane.f32.xlu0 %v267_v5 }
 0x1a3   :  { %v233_v7 = vadd.f32 %v349_v41, %v232_v6  ;;  %v261_v8 = vmul.f32 %v356_v45, %v247_v4  ;;  %v283_v14 = vsel %vm282_vm2, %v263_v11, 0.0 }
 0x1a5   :  { %v248_v9 = vmax.f32 %v233_v7, 0.0  ;;  %v276_v10 = vsel %vm166_vm1, %v261_v8, 0.0 }
 0x1a6   :  { %277 = vadd.xlane.f32.xlu0 %v276_v10 }
 0x1a7   :  { %v262_v12 = vmul.f32 %v356_v45, %v248_v9 }
 0x1a9   :  { %v279_v13 = vsel %vm166_vm1, %v262_v12, 0.0 }
 0x1aa   :  { %280 = vadd.xlane.f32.xlu1 %v279_v13  ;;  %284 = vadd.xlane.f32.xlu0 %v283_v14 }
 0x225   :  { %v272_v18 = vpop.xlane.xlu1 %271 }
 0x226   :  { %v290_v21 = vadd.f32 %v287_v15, %v272_v18 }
 0x227   :  { %v266_v16 = vpop.xlane.xlu0 %265 }
 0x228   :  { %v288_v17 = vadd.f32 %v287_v15, %v266_v16 }
 0x229   :  { %v275_v22 = vpop.xlane.xlu1 %274 }
 0x22a   :  { %295 = vxpose.xlu1.b32.start [1/7] (short) (narrow) %v288_v17, 8  ;;  %v291_v23 = vadd.f32 %v287_v15, %v275_v22 }
 0x22b   :  { %v269_v19 = vpop.xlane.xlu0 %268 }
 0x22c   :  { %v289_v20 = vadd.f32 %v287_v15, %v269_v19 }
 0x22e   :  { %296 = vxpose.xlu1.b32.cont [2/7] (short) (narrow) %v289_v20, 8 }
 0x22f   :  { %v278_v24 = vpop.xlane.xlu0 %277 }
 0x230   :  { %v292_v25 = vadd.f32 %v287_v15, %v278_v24 }
 0x232   :  { %297 = vxpose.xlu1.b32.cont [3/7] (short) (narrow) %v290_v21, 8 }
 0x233   :  { %v281_v26 = vpop.xlane.xlu1 %280  ;;  %v285_v28 = vpop.xlane.xlu0 %284 }
 0x234   :  { %v293_v27 = vadd.f32 %v287_v15, %v281_v26  ;;  %v294_v29 = vadd.f32 %v287_v15, %v285_v28 }
 0x236   :  { %298 = vxpose.xlu1.b32.cont [4/7] (short) (narrow) %v291_v23, 8 }
 0x23a   :  { %299 = vxpose.xlu1.b32.cont [5/7] (short) (narrow) %v292_v25, 8 }
 0x23e   :  { %300 = vxpose.xlu1.b32.cont [6/7] (short) (narrow) %v293_v27, 8 }
 0x242   :  { %301 = vxpose.xlu1.b32.end [7/7] (short) (narrow) %v294_v29, 8 }
 0x2a6   :  { %v311_v30 = vpop.trf.xlu1 }
 0x2a7   :  { %328 = vst.msk [vmem:[#allocation3] sm:$0x1] %vm327_vm3, %v311_v30 }
 0x2a8   :  { %406 = shalt.err (!%p403_p4)
}
 0x2a9   :  { %338 = dma.vmem_to_hbm [thread:$0]  %s336_s23, 16, %s524_s7, [#allocation4]  }
 0x2aa   :  { %415 = dma.done.wait [#allocation4], 16  }
 0x2ab   :  { %416 = vsyncadd [#allocation4], 4294967280 }
 0x2ac   :  { %342 = vsyncpa [#allocation4], 1 }

</bundles_post_ra>
